<compile_context>
chip_gen: v5e
topology: v5e:2x2
jax: 0.10.0
libtpu: 0.0.40
codegen_flags: <defaults>
</compile_context>

<pallas_src>
import functools

import jax
import jax.numpy as jnp
from jax.experimental import pallas as pl
from jax.experimental.pallas import tpu as pltpu

_LANES = 128
_SUBLANES = 8
_TILE = _LANES * _SUBLANES  # 1024 f32 elements = one vreg


def _nonsat_kernel(x_ref, o_ref, *, sum_threshold, max_iter):
    """Newton fixed-point solve of y^3/3 + y = x, whole (lane-dense) tensor in VMEM.

    Global stopping rule: sum(|y_new - y|) <= ep * N_original
    (== mean(|y_new - y|) <= ep over the ORIGINAL, unpadded element count).
    """
    x = x_ref[...]  # f32, (rows, 128)

    def cond(state):
        _, _, stop = state
        return jnp.logical_not(stop)

    def body(state):
        y, i, _ = state
        y2 = y * y
        # (2/3)*y^3 + x, then multiply by 1/(y^2+1) (reciprocal goes to the EUP slot).
        y_new = (y * y2 * (2.0 / 3.0) + x) * pl.reciprocal(y2 + 1.0, approx=False)
        diff_sum = jnp.sum(jnp.abs(y_new - y))  # global reduction (XLU)
        stop = jnp.logical_or(diff_sum <= sum_threshold, i > max_iter)
        return y_new, i + 1, stop

    y_final, _, _ = jax.lax.while_loop(
        cond, body, (x, jnp.int32(0), jnp.array(False))
    )
    o_ref[...] = y_final


def nonsat_activation_ref(x, ep=0.0001, max_iter=100):
    """Pure-JAX reference with the exact PyTorch semantics (mean-based stop)."""
    x = x.astype(jnp.float32)

    def cond(state):
        _, _, stop = state
        return jnp.logical_not(stop)

    def body(state):
        y, i, _ = state
        y_new = (2.0 * y ** 3.0 / 3.0 + x) / (y ** 2.0 + 1.0)
        diff = jnp.mean(jnp.abs(y_new - y))
        stop = jnp.logical_or(diff <= ep, i > max_iter)
        return y_new, i + 1, stop

    y, _, _ = jax.lax.while_loop(cond, body, (x, jnp.int32(0), jnp.array(False)))
    return y


def nonsat_activation_pallas(x, ep=0.0001, max_iter=100):
    """Pallas TPU nonsat_activation. Lane-dense whole-tensor VMEM-resident kernel."""
    orig_shape = x.shape
    orig_dtype = x.dtype
    n = int(x.size)
    n_pad = pl.cdiv(n, _TILE) * _TILE
    f32_bytes = n_pad * 4

    # Working set: input block + output block + live y carry (+ pipeline buffers) ~ 6x.
    vmem_needed = 6 * f32_bytes + (2 << 20)
    if vmem_needed > (56 << 20):
        # Too large for the whole-block design on the tightest generation (v7x: 64 MiB).
        # TODO(synk): for very large activations, chunk/tile with a cross-tile partial-sum
        #             reduction each iteration instead of falling back.
        return nonsat_activation_ref(x, ep, max_iter).astype(orig_dtype)

    xf = jnp.ravel(x).astype(jnp.float32)
    if n_pad != n:
        xf = jnp.pad(xf, (0, n_pad - n))  # pads sit at the x=0,y=0 fixed point -> diff 0
    x2d = xf.reshape(n_pad // _LANES, _LANES)  # lane-dense: full 128-lane vregs

    kernel = functools.partial(
        _nonsat_kernel,
        sum_threshold=float(ep) * float(n),  # ORIGINAL element count -> exact mean rule
        max_iter=int(max_iter),
    )
    out2d = pl.pallas_call(
        kernel,
        out_shape=jax.ShapeDtypeStruct(x2d.shape, jnp.float32),
        in_specs=[pl.BlockSpec(memory_space=pltpu.MemorySpace.VMEM)],
        out_specs=pl.BlockSpec(memory_space=pltpu.MemorySpace.VMEM),
        input_output_aliases={0: 0},  # reuse the wrapper-local padded HBM buffer
        compiler_params=pltpu.CompilerParams(
            vmem_limit_bytes=int(max(vmem_needed, 32 << 20)),
        ),
    )(x2d)

    return out2d.reshape(-1)[:n].reshape(orig_shape).astype(orig_dtype)


if __name__ == "__main__":
    key = jax.random.PRNGKey(0)

    # Small NCHW activation, consistent with a conv-net activation module.
    x = jax.random.normal(key, (2, 4, 16, 16), dtype=jnp.float32)
    out = jax.block_until_ready(nonsat_activation_pallas(x))
    ref = jax.block_until_ready(nonsat_activation_ref(x))
    assert out.shape == x.shape and out.dtype == x.dtype
    assert jnp.max(jnp.abs(out - ref.astype(x.dtype))) < 5e-5, "mismatch vs. reference"

    # Also exercise the zero-padded (non-multiple-of-1024) path.
    x2 = jax.random.normal(jax.random.PRNGKey(1), (2, 3, 7, 11), dtype=jnp.float32)
    out2 = jax.block_until_ready(nonsat_activation_pallas(x2))
    ref2 = jax.block_until_ready(nonsat_activation_ref(x2))
    assert out2.shape == x2.shape and out2.dtype == x2.dtype
    assert jnp.max(jnp.abs(out2 - ref2.astype(x2.dtype))) < 5e-5, "padded-path mismatch"

    print("KERNEL_OK")
</pallas_src>

<mosaic_0001>
module attributes {stable_mosaic.version = 11 : i64} {
  func.func @_nonsat_kernel(%arg0: memref<16x128xf32, #tpu.memory_space<vmem>>, %arg1: memref<16x128xf32, #tpu.memory_space<vmem>>) attributes {dimension_semantics = [], scalar_prefetch = 0 : i64, scratch_operands = 0 : i64, tpu.core_type = #tpu.core_type<tc>} {
    %c0 = arith.constant 0 : index
    %c0_0 = arith.constant 0 : index
    %0 = vector.load %arg0[%c0, %c0_0] : memref<16x128xf32, #tpu.memory_space<vmem>>, vector<16x128xf32>
    %c0_i32 = arith.constant 0 : i32
    %false = arith.constant false
    %1:3 = scf.while (%arg2 = %0, %arg3 = %c0_i32, %arg4 = %false) : (vector<16x128xf32>, i32, i1) -> (vector<16x128xf32>, i32, i1) {
      %true = arith.constant true
      %3 = arith.xori %arg4, %true : i1
      scf.condition(%3) %arg2, %arg3, %arg4 : vector<16x128xf32>, i32, i1
    } do {
    ^bb0(%arg2: vector<16x128xf32>, %arg3: i32, %arg4: i1):
      %3 = arith.mulf %arg2, %arg2 : vector<16x128xf32>
      %4 = arith.mulf %arg2, %3 : vector<16x128xf32>
      %cst = arith.constant 0.666666686 : f32
      %5 = vector.broadcast %cst : f32 to vector<16x128xf32>
      %6 = arith.mulf %4, %5 : vector<16x128xf32>
      %7 = arith.addf %6, %0 : vector<16x128xf32>
      %cst_3 = arith.constant 1.000000e+00 : f32
      %8 = vector.broadcast %cst_3 : f32 to vector<16x128xf32>
      %9 = arith.addf %3, %8 : vector<16x128xf32>
      %10 = tpu.reciprocal %9 : vector<16x128xf32> -> vector<16x128xf32>
      %11 = arith.mulf %7, %10 : vector<16x128xf32>
      %12 = arith.subf %11, %arg2 : vector<16x128xf32>
      %13 = math.absf %12 : vector<16x128xf32>
      %14 = vector.shape_cast %13 : vector<16x128xf32> to vector<1x16x128xf32>
      %cst_4 = arith.constant dense<0.000000e+00> : vector<1xf32>
      %15 = vector.multi_reduction <add>, %14, %cst_4 [1, 2] : vector<1x16x128xf32> to vector<1xf32>
      %16 = vector.shape_cast %15 : vector<1xf32> to vector<1x1x1xf32>
      %17 = vector.extract %16[0, 0, 0] : f32 from vector<1x1x1xf32>
      %cst_5 = arith.constant 2.048000e-01 : f32
      %18 = arith.cmpf ole, %17, %cst_5 : f32
      %c100_i32 = arith.constant 100 : i32
      %19 = arith.cmpi sgt, %arg3, %c100_i32 : i32
      %20 = arith.ori %18, %19 : i1
      %c1_i32 = arith.constant 1 : i32
      %21 = arith.addi %arg3, %c1_i32 : i32
      scf.yield %11, %21, %20 : vector<16x128xf32>, i32, i1
    }
    %c0_1 = arith.constant 0 : index
    %c0_2 = arith.constant 0 : index
    %2 = vector.load %arg1[%c0_1, %c0_2] : memref<16x128xf32, #tpu.memory_space<vmem>>, vector<16x128xf32>
    tpu.vector_store %arg1[%c0_1, %c0_2], %1#0 {strides = array<i32>} : memref<16x128xf32, #tpu.memory_space<vmem>>, vector<16x128xf32>,
    return
  }
}

</mosaic_0001>

<bundles_post_ra>
// kernel: tpu_custom_call.1
= control target key start
LH: loop header
LB: loop body
LE: loop exit
PB: predicated region body
PF: predicated region fallthrough
CT: control target
= control target key end

     0   :  { %6 = vsyncpa [#allocation3], 0  ;;  %s288_s0 = inlined_call_operand.hbm [shape: f32[16,128], index: 0, kind: input, shape index: {}, may-alias: {0,1}]   ;;  %s289_s1 = inlined_call_operand.hbm [shape: f32[16,128], index: 1, kind: output, shape index: {}, may-alias: {0,1}]  }
   0x1   :  { %7 = vsyncpa [#allocation4], 0  ;;  %s12_s8 = sshll.u32 %s288_s0, 4  ;;  %s235_s9 = smov [#allocation2]   ;;  %s13_s8 = int_to_ptr.hbm [resolvable:$true] %s12_s8 }
   0x2   :  { %s14_s10 = sshll.u32 %s235_s9, 4  ;;  %s236_s11 = smov 128   ;;  %s15_s10 = int_to_ptr.vmem [resolvable:$true] %s14_s10 }
   0x3   :  { %s237_s12 = smov 8  }
   0x4   :  { %20 = dma.hbm_to_vmem [thread:$0]  %s13_s8, 256, %s15_s10, [#allocation3], %s236_s11, %s236_s11, %s237_s12  }
   0x5   :  { %219 = dma.done.wait [#allocation3], 256  }
   0x6   :  { %220 = vsyncadd [#allocation3], 4294967040  ;;  %v255_v0 = vld [vmem:[#allocation2] sm:$0xff]   ;;  %v257_v1 = vld [vmem:[#allocation2 + $0x8] sm:$0xff]   ;;  %s259_s13 = smov 0  }
   0x7   :  { %v290_v2 = vmov %v257_v1  ;;  %v291_v3 = vmov %v255_v0 }
   0x8 LB: > { %v35_v4 = vmul.f32 %v233_v3, %v233_v3  ;;  %v36_v5 = vmul.f32 %v229_v2, %v229_v2  ;;  %s92_s0 = sadd.s32 1, %s225_s13   ;;  %p90_p0 = scmp.gt.s32.totalorder %s225_s13, 100  ;;  %v233_v3 = vphi %v291_v3, %v294_v3   ;;  %v229_v2 = vphi %v290_v2, %v293_v2   ;;  %s225_s13 = sphi %s259_s13, %s292_s13  }
   0x9   : > { %s292_s13 = smov %s92_s0 }
   0xa   : > { %v43_v6 = vadd.f32 1.0, %v35_v4  ;;  %v44_v7 = vadd.f32 1.0, %v36_v5  ;;  %v37_v8 = vmul.f32 %v233_v3, %v35_v4  ;;  %v38_v9 = vmul.f32 %v229_v2, %v36_v5 }
   0xc   : > { %155 = vrcp.f32 %v43_v6  ;;  %v39_v12 = vmul.f32 0.6666667, %v37_v8  ;;  %v40_v14 = vmul.f32 0.6666667, %v38_v9  ;;  %vm50_vm0 = vweird.f32 %v43_v6 }
   0xd   : > { %157 = vrcp.f32 %v44_v7  ;;  %v56_v15 = vand.u32 2147483648, %v43_v6  ;;  %v54_v18 = vand.u32 2147483647, %v43_v6  ;;  %v70_v19 = vand.u32 2147483648, %v44_v7 }
   0xe   : > { %vm64_vm2 = vweird.f32 %v44_v7  ;;  %v68_v21 = vand.u32 2147483647, %v44_v7  ;;  %v41_v25 = vadd.f32 %v39_v12, %v255_v0  ;;  %v42_v28 = vadd.f32 %v40_v14, %v257_v1 }
   0xf   : > { %v57_v23 = vor.u32 1.1754944e-38, %v56_v15  ;;  %vm55_vm5 = vcmp.eq.f32.partialorder %v54_v18, 8.507059e+37  ;;  %v71_v27 = vor.u32 1.1754944e-38, %v70_v19 }
  0x10   : > { %vm69_vm7 = vcmp.eq.f32.partialorder %v68_v21, 8.507059e+37 }
  0x12   : > { %v156_v10 = vpop.eup %155 }
  0x13   : > { %v158_v11 = vpop.eup %157  ;;  %v46_v13 = vmul.f32 %v156_v10, %v43_v6  ;;  %vm51_vm1 = vweird.f32 %v156_v10 }
  0x14   : > { %v60_v16 = vmul.f32 %v158_v11, %v44_v7  ;;  %vm65_vm3 = vweird.f32 %v158_v11  ;;  %vm52_vm4 = vmor %vm50_vm0, %vm51_vm1 }
  0x15   : > { %v47_v17 = vsub.f32 1.0, %v46_v13  ;;  %vm66_vm6 = vmor %vm64_vm2, %vm65_vm3 }
  0x16   : > { %v61_v20 = vsub.f32 1.0, %v60_v16 }
  0x17   : > { %v48_v22 = vmul.f32 %v156_v10, %v47_v17 }
  0x18   : > { %v62_v24 = vmul.f32 %v158_v11, %v61_v20 }
  0x19   : > { %v49_v26 = vadd.f32 %v156_v10, %v48_v22 }
  0x1a   : > { %v63_v29 = vadd.f32 %v158_v11, %v62_v24 }
  0x1b   : > { %v53_v30 = vsel %vm52_vm4, %v156_v10, %v49_v26 }
  0x1c   : > { %v58_v31 = vsel %vm55_vm5, %v57_v23, %v53_v30  ;;  %v67_v32 = vsel %vm66_vm6, %v158_v11, %v63_v29 }
  0x1d   : > { %v72_v33 = vsel %vm69_vm7, %v71_v27, %v67_v32  ;;  %v73_v34 = vmul.f32 %v58_v31, %v41_v25  }
  0x1e   : > { %v74_v35 = vmul.f32 %v72_v33, %v42_v28  }
  0x1f   : > { %v75_v36 = vsub.f32 %v73_v34, %v233_v3  ;;  %v294_v3 = vmov %v73_v34 }
  0x20   : > { %v76_v37 = vsub.f32 %v74_v35, %v229_v2  ;;  %v293_v2 = vmov %v74_v35 }
  0x21   : > { %v77_v38 = vand.u32 2147483647, %v75_v36 }
  0x22   : > { %v78_v39 = vand.u32 2147483647, %v76_v37 }
  0x24   : > { %v79_v40 = vadd.f32 %v78_v39, %v77_v38 }
  0x26   : > { %80 = vadd.xlane.f32.xlu0 %v79_v40 }
  0x99   : > { %v81_v41 = vpop.xlane.xlu0 %80 }
  0x9a   : > { %v82_v42 = vrot.slane %v81_v41, 4 }
  0x9c   : > { %v83_v43 = vadd.f32 %v82_v42, %v81_v41 }
  0x9e   : > { %v84_v44 = vrot.slane %v83_v43, 2 }
  0xa0   : > { %v85_v45 = vadd.f32 %v84_v44, %v83_v43 }
  0xa2   : > { %v86_v46 = vrot.slane %v85_v45, 1 }
  0xa4   : > { %v87_v47 = vadd.f32 %v86_v46, %v85_v45 }
  0xa6   : > { %125 = vpush %v87_v47 }
  0xd7   : > { %s126_s14 = spop %125 }
  0xd8   : > { %p89_p1 = scmp.le.f32.partialorder %s126_s14, 0.2048 }
  0xda   : > { %p91_p2 = por %p90_p0, %p89_p1 }
  0xdb   :  { %93 = vst [vmem:[#allocation5] sm:$0xff] (%p91_p2), %v73_v34  ;;  %s101_s17 = sshll.u32 (%p91_p2), %s289_s1, 4  ;;  %s238_s18 = smov (%p91_p2), [#allocation5]   ;;  %s102_s17 = int_to_ptr.hbm [resolvable:$true] %s101_s17 }
  0xdc   :  { %34 = sbr.rel (!%p91_p2) target bundleno = 8 (0x8), region = 35  ;;  %94 = vst [vmem:[#allocation5 + $0x8] sm:$0xff] (%p91_p2), %v74_v35  ;;  %s99_s19 = sshll.u32 (%p91_p2), %s238_s18, 4  ;;  %s100_s19 = int_to_ptr.vmem [resolvable:$true] %s99_s19 }
  0xdd   :  { %107 = dma.vmem_to_hbm [thread:$0]  (%p91_p2), %s100_s19, 256, %s102_s17, [#allocation4], %s236_s11, %s236_s11, %s237_s12  }
  0xe1   :  { %221 = dma.done.wait [#allocation4], 256  }
  0xe2   :  { %222 = vsyncadd [#allocation4], 4294967040 }
  0xe3   :  { %112 = vsyncpa [#allocation3], 1 }
  0xe4   :  { %113 = vsyncpa [#allocation4], 1 }

</bundles_post_ra>
